<compile_context>
chip_gen: v7x
topology: tpu7x:2x2x1
jax: 0.10.0
libtpu: 0.0.40
codegen_flags: <defaults>
</compile_context>

<pallas_src>
import jax
import jax.numpy as jnp
from jax.experimental import pallas as pl
from jax.experimental.pallas import tpu as pltpu

EPS = 1e-5


def _conv_bn_relu_kernel(x_ref, w_ref, p_ref, o_ref):
    # x_ref: (Cin,  M)       f32   (cast to bf16 in-kernel, VPU slack)
    # w_ref: (Cblk, Cin)     bf16
    # p_ref: (Cblk, 2)       f32   [:,0]=gamma, [:,1]=beta
    # o_ref: (Cblk, M)       f32 (or bf16 if out_dtype says so)
    x = x_ref[...].astype(jnp.bfloat16)

    # 1x1 conv == per-pixel channel mixing: (Cblk,Cin)@(Cin,M) on the MXU,
    # bf16 operands, f32 accumulation.
    y = jnp.dot(w_ref[...], x, preferred_element_type=jnp.float32)

    m = y.shape[1]
    inv_m = 1.0 / float(m)

    # Single-pass batch statistics per output channel (lane-axis reductions go
    # to the XLU).  Matches PyTorch training-mode BN: biased variance over all
    # N*H*W pixels.  (E[y^2]-mean^2 is fine in f32 at M=196; switch to a
    # two-pass form if this is ever generalized to much larger M.)
    s = jnp.sum(y, axis=1, keepdims=True)          # (Cblk, 1)
    sq = jnp.sum(y * y, axis=1, keepdims=True)     # (Cblk, 1)
    mean = s * inv_m
    var = jnp.maximum(sq * inv_m - mean * mean, 0.0)

    gamma = p_ref[:, 0:1]                          # (Cblk, 1)
    beta = p_ref[:, 1:2]                           # (Cblk, 1)

    # Fold gamma into inv_std so the (Cblk, M) elementwise pass is one FMA
    # followed by the ReLU max.
    scale = gamma * jax.lax.rsqrt(var + EPS)       # (Cblk, 1)
    shift = beta - mean * scale                    # (Cblk, 1)

    o_ref[...] = jnp.maximum(y * scale + shift, 0.0).astype(o_ref.dtype)


def _default_cout_split():
    """2 if the device exposes >1 TensorCore (v7x / megacore), else 1."""
    try:
        dev = jax.devices()[0]
        kind = str(getattr(dev, "device_kind", "")).lower()
        if "v7" in kind:
            return 2
        if int(getattr(dev, "num_cores", 1) or 1) > 1:
            return 2
    except Exception:
        pass
    return 1


def conv1x1_bn_relu(x_nchw, w_oihw, gamma, beta, *,
                    out_dtype=jnp.float32, cout_split=None):
    """x_nchw: (N, Cin, H, W); w_oihw: (Cout, Cin, 1, 1); gamma/beta: (Cout,)."""
    n, cin, h, wdim = x_nchw.shape
    cout = w_oihw.shape[0]
    hw = h * wdim

    if n == 1:
        # Native-layout matmul operand: NCHW with N=1 is already (Cin, HW).
        x2d = x_nchw.reshape(cin, hw)                          # free reshape
    else:
        # TODO(synk): replace this wrapper transpose with a batch grid axis
        # (Squeezed leading block dim, s/sq accumulated in VMEM scratch across
        # an "arbitrary" axis, normalize in a second sweep) so no extra HBM
        # pass over x is materialized for N>1.  Not exercised by this module
        # (fixed N=1); kept as a slow-but-correct fallback.
        x2d = jnp.transpose(x_nchw, (1, 0, 2, 3)).reshape(cin, n * hw)
    m = x2d.shape[1]
    x2d = x2d.astype(jnp.float32)      # no-op for f32 input; bf16 cast is in-kernel

    w2d = w_oihw.reshape(cout, cin).astype(jnp.bfloat16)       # tiny/constant
    # gamma|beta packed lane-contiguously: one DMA instead of two narrow ones.
    params = jnp.stack(
        [gamma.astype(jnp.float32), beta.astype(jnp.float32)], axis=1)  # (Cout, 2)

    if cout_split is None:
        cout_split = _default_cout_split()
    if cout % cout_split != 0 or (cout // cout_split) % 8 != 0:
        cout_split = 1
    cblk = cout // cout_split

    # TODO(synk): BatchNorm running_mean/var update (momentum=0.1) is a
    # training-time module-state side effect, not part of the forward output;
    # it is not implemented here.

    out2d = pl.pallas_call(
        _conv_bn_relu_kernel,
        out_shape=jax.ShapeDtypeStruct((cout, m), out_dtype),
        grid=(cout_split,),
        in_specs=[
            pl.BlockSpec((cin, m), lambda i: (0, 0)),     # x resident across grid
            pl.BlockSpec((cblk, cin), lambda i: (i, 0)),  # per-core channel block
            pl.BlockSpec((cblk, 2), lambda i: (i, 0)),
        ],
        out_specs=pl.BlockSpec((cblk, m), lambda i: (i, 0)),
        compiler_params=pltpu.CompilerParams(
            dimension_semantics=("parallel",)
        ),
    )(x2d, w2d, params)

    # (Cout, M) -> NCHW (free reshape for N=1).
    if n == 1:
        return out2d.reshape(1, cout, h, wdim)
    return jnp.transpose(out2d.reshape(cout, n, h, wdim), (1, 0, 2, 3))


def _reference(x_nchw, w_oihw, gamma, beta, matmul_dtype=jnp.float32):
    # Pure-JAX reference mirroring PyTorch training-mode BN semantics.
    n, cin, h, wdim = x_nchw.shape
    cout = w_oihw.shape[0]
    x2d = jnp.transpose(x_nchw, (0, 2, 3, 1)).reshape(-1, cin)
    w2d = w_oihw.reshape(cout, cin).T
    y = jnp.dot(x2d.astype(matmul_dtype), w2d.astype(matmul_dtype),
                preferred_element_type=jnp.float32)
    mean = jnp.mean(y, axis=0, keepdims=True)
    var = jnp.mean((y - mean) ** 2, axis=0, keepdims=True)
    yhat = (y - mean) / jnp.sqrt(var + EPS) * gamma[None, :] + beta[None, :]
    yhat = jnp.maximum(yhat, 0.0)
    return jnp.transpose(yhat.reshape(n, h, wdim, cout), (0, 3, 1, 2))


if __name__ == "__main__":
    key = jax.random.PRNGKey(0)
    kx, kw = jax.random.split(key)

    N, CIN, H, W = 1, 256, 14, 14
    COUT = 128

    # Deterministic synthetic inputs/parameters (shapes from the module).
    x = jax.random.normal(kx, (N, CIN, H, W), dtype=jnp.float32)
    conv_w = jax.random.normal(kw, (COUT, CIN, 1, 1), dtype=jnp.float32) * 0.05
    bn_gamma = jnp.ones((COUT,), dtype=jnp.float32)   # PyTorch BN init
    bn_beta = jnp.zeros((COUT,), dtype=jnp.float32)   # PyTorch BN init

    out = conv1x1_bn_relu(x, conv_w, bn_gamma, bn_beta)
    out = jax.block_until_ready(out)
    assert out.shape == (N, COUT, H, W)

    # Matched-precision reference (same bf16 matmul operands, f32 accum).
    ref_matched = _reference(x, conv_w, bn_gamma, bn_beta,
                             matmul_dtype=jnp.bfloat16)
    # Full-f32 reference (exact PyTorch math) with a bf16-commensurate tol.
    ref_f32 = _reference(x, conv_w, bn_gamma, bn_beta,
                         matmul_dtype=jnp.float32)

    assert jnp.max(jnp.abs(out - ref_matched)) < 5e-3
    assert jnp.max(jnp.abs(out - ref_f32)) < 5e-2

    print("KERNEL_OK")
</pallas_src>

<mosaic_0001>
module attributes {stable_mosaic.version = 11 : i64} {
  func.func @_conv_bn_relu_kernel(%arg0: i32, %arg1: memref<256x196xf32, #tpu.memory_space<vmem>>, %arg2: memref<128x256xbf16, #tpu.memory_space<vmem>>, %arg3: memref<128x2xf32, #tpu.memory_space<vmem>>, %arg4: memref<128x196xf32, #tpu.memory_space<vmem>>) attributes {dimension_semantics = [#tpu.dimension_semantics<parallel>], iteration_bounds = array<i64: 1>, scalar_prefetch = 0 : i64, scratch_operands = 0 : i64, tpu.core_type = #tpu.core_type<tc>, window_params = [{pipeline_mode = #tpu.pipeline_mode<synchronous>, transform_indices = @transform_0, window_bounds = array<i64: 256, 196>}, {transform_indices = @transform_1, window_bounds = array<i64: 128, 256>}, {transform_indices = @transform_2, window_bounds = array<i64: 128, 2>}, {transform_indices = @transform_3, window_bounds = array<i64: 128, 196>}]} {
    %c0 = arith.constant 0 : index
    %c0_0 = arith.constant 0 : index
    %0 = vector.load %arg1[%c0, %c0_0] : memref<256x196xf32, #tpu.memory_space<vmem>>, vector<256x196xf32>
    %1 = arith.truncf %0 : vector<256x196xf32> to vector<256x196xbf16>
    %c0_1 = arith.constant 0 : index
    %c0_2 = arith.constant 0 : index
    %2 = vector.load %arg2[%c0_1, %c0_2] : memref<128x256xbf16, #tpu.memory_space<vmem>>, vector<128x256xbf16>
    %cst = arith.constant dense<0.000000e+00> : vector<128x196xf32>
    %3 = tpu.matmul %2, %1, %cst {dimension_numbers = #tpu.dot_dimension_numbers<[1], [0], [0], [1], [0, 0, 1, 1], [], []>} : vector<128x256xbf16>, vector<256x196xbf16>, vector<128x196xf32> -> vector<128x196xf32>
    %cst_3 = arith.constant dense<0.000000e+00> : vector<128xf32>
    %4 = vector.multi_reduction <add>, %3, %cst_3 [1] : vector<128x196xf32> to vector<128xf32>
    %5 = vector.shape_cast %4 : vector<128xf32> to vector<128x1xf32>
    %6 = arith.mulf %3, %3 : vector<128x196xf32>
    %cst_4 = arith.constant dense<0.000000e+00> : vector<128xf32>
    %7 = vector.multi_reduction <add>, %6, %cst_4 [1] : vector<128x196xf32> to vector<128xf32>
    %8 = vector.shape_cast %7 : vector<128xf32> to vector<128x1xf32>
    %cst_5 = arith.constant 0.00510204071 : f32
    %9 = vector.broadcast %cst_5 : f32 to vector<128x1xf32>
    %10 = arith.mulf %5, %9 : vector<128x1xf32>
    %cst_6 = arith.constant 0.00510204071 : f32
    %11 = vector.broadcast %cst_6 : f32 to vector<128x1xf32>
    %12 = arith.mulf %8, %11 : vector<128x1xf32>
    %13 = arith.mulf %10, %10 : vector<128x1xf32>
    %14 = arith.subf %12, %13 : vector<128x1xf32>
    %cst_7 = arith.constant 0.000000e+00 : f32
    %15 = vector.broadcast %cst_7 : f32 to vector<128x1xf32>
    %16 = arith.maximumf %14, %15 : vector<128x1xf32>
    %c0_8 = arith.constant 0 : index
    %c0_9 = arith.constant 0 : index
    %17 = vector.load %arg3[%c0_8, %c0_9] : memref<128x2xf32, #tpu.memory_space<vmem>>, vector<128x1xf32>
    %c0_10 = arith.constant 0 : index
    %c1 = arith.constant 1 : index
    %18 = vector.load %arg3[%c0_10, %c1] : memref<128x2xf32, #tpu.memory_space<vmem>>, vector<128x1xf32>
    %cst_11 = arith.constant 9.99999974E-6 : f32
    %19 = vector.broadcast %cst_11 : f32 to vector<128x1xf32>
    %20 = arith.addf %16, %19 : vector<128x1xf32>
    %21 = math.rsqrt %20 : vector<128x1xf32>
    %22 = arith.mulf %17, %21 : vector<128x1xf32>
    %23 = arith.mulf %10, %22 : vector<128x1xf32>
    %24 = arith.subf %18, %23 : vector<128x1xf32>
    %25 = vector.broadcast %22 : vector<128x1xf32> to vector<128x196xf32>
    %26 = arith.mulf %3, %25 : vector<128x196xf32>
    %27 = vector.broadcast %24 : vector<128x1xf32> to vector<128x196xf32>
    %28 = arith.addf %26, %27 : vector<128x196xf32>
    %cst_12 = arith.constant 0.000000e+00 : f32
    %29 = vector.broadcast %cst_12 : f32 to vector<128x196xf32>
    %30 = arith.maximumf %28, %29 : vector<128x196xf32>
    %c0_13 = arith.constant 0 : index
    %c0_14 = arith.constant 0 : index
    %31 = vector.load %arg4[%c0_13, %c0_14] : memref<128x196xf32, #tpu.memory_space<vmem>>, vector<128x196xf32>
    tpu.vector_store %arg4[%c0_13, %c0_14], %30 {strides = array<i32>} : memref<128x196xf32, #tpu.memory_space<vmem>>, vector<128x196xf32>,
    return
  }
  func.func @transform_0(%arg0: i32) -> (i32, i32) {
    %c0_i32 = arith.constant 0 : i32
    %c0_i32_0 = arith.constant 0 : i32
    %c0_i32_1 = arith.constant 0 : i32
    return %c0_i32, %c0_i32_0 : i32, i32
  }
  func.func @transform_1(%arg0: i32) -> (i32, i32) {
    %c0_i32 = arith.constant 0 : i32
    %c0_i32_0 = arith.constant 0 : i32
    return %arg0, %c0_i32 : i32, i32
  }
  func.func @transform_2(%arg0: i32) -> (i32, i32) {
    %c0_i32 = arith.constant 0 : i32
    %c0_i32_0 = arith.constant 0 : i32
    return %arg0, %c0_i32 : i32, i32
  }
  func.func @transform_3(%arg0: i32) -> (i32, i32) {
    %c0_i32 = arith.constant 0 : i32
    %c0_i32_0 = arith.constant 0 : i32
    return %arg0, %c0_i32 : i32, i32
  }
}

</mosaic_0001>

<bundles_post_ra>
// kernel: tpu_custom_call.1
= control target key start
LH: loop header
LB: loop body
LE: loop exit
PB: predicated region body
PF: predicated region fallthrough
CT: control target
= control target key end

     0   :  { %vm319_vm0 = vcmask 556032   ;;  %s1124_s15 = smov 1   ;;  %s2015_s0 = inlined_call_operand.vmem [shape: f32[256,196], index: 0, kind: input, shape index: {}]   ;;  %s2016_s1 = inlined_call_operand.vmem [shape: bf16[128,256], index: 1, kind: input, shape index: {}]   ;;  %s2017_s2 = inlined_call_operand.vmem [shape: f32[128,2], index: 2, kind: input, shape index: {}]   ;;  %s2018_s3 = inlined_call_operand.vmem [shape: f32[128,196], index: 3, kind: output, shape index: {}]  }
   0x1   :  { %v15_v0 = vld [vmem:[%s2015_s0 + $0x8] sm:$0xff]  ;;  %v17_v1 = vld [vmem:[%s2015_s0 + $0x18] sm:$0xff]  ;;  %v14_v2 = vld [vmem:[%s2015_s0] sm:$0xff] }
   0x2   :  { %v79_v3 = vpack.c.bf16 %v17_v1, %v15_v0  ;;  %v16_v4 = vld [vmem:[%s2015_s0 + $0x10] sm:$0xff]  ;;  %v19_v5 = vld [vmem:[%s2015_s0 + $0x28] sm:$0xff]  ;;  %v21_v6 = vld [vmem:[%s2015_s0 + $0x38] sm:$0xff] }
   0x3   :  { %v78_v7 = vpack.c.bf16 %v16_v4, %v14_v2  ;;  %v81_v8 = vpack.c.bf16 %v21_v6, %v19_v5  ;;  %v18_v9 = vld [vmem:[%s2015_s0 + $0x20] sm:$0xff]  ;;  %v20_v10 = vld [vmem:[%s2015_s0 + $0x30] sm:$0xff]  ;;  %v23_v11 = vld [vmem:[%s2015_s0 + $0x48] sm:$0xff] }
   0x4   :  { %206 = vmatprep.subr.bf16.mxu0 %v79_v3  ;;  %1028 = vmatprep.subr.bf16.mxu1 %v79_v3  ;;  %v25_v12 = vld [vmem:[%s2015_s0 + $0x58] sm:$0xff]  ;;  %v80_v13 = vpack.c.bf16 %v20_v10, %v18_v9  ;;  %v22_v15 = vld [vmem:[%s2015_s0 + $0x40] sm:$0xff]  ;;  %v24_v16 = vld [vmem:[%s2015_s0 + $0x50] sm:$0xff] }
   0x5   :  { %207 = vmatpush1.bf16.msra.mxu0 %v78_v7  ;;  %1044 = vmatpush1.bf16.msra.mxu1 %v78_v7  ;;  %v83_v14 = vpack.c.bf16 %v25_v12, %v23_v11  ;;  %v27_v17 = vld [vmem:[%s2015_s0 + $0x68] sm:$0xff]  ;;  %v29_v18 = vld [vmem:[%s2015_s0 + $0x78] sm:$0xff]  ;;  %v82_v19 = vpack.c.bf16 %v24_v16, %v22_v15  ;;  %v26_v21 = vld [vmem:[%s2015_s0 + $0x60] sm:$0xff] }
   0x6   :  { %208 = vmatprep.subr.bf16.mxu0 %v81_v8  ;;  %1029 = vmatprep.subr.bf16.mxu1 %v81_v8  ;;  %v85_v20 = vpack.c.bf16 %v29_v18, %v27_v17  ;;  %v28_v22 = vld [vmem:[%s2015_s0 + $0x70] sm:$0xff]  ;;  %v31_v23 = vld [vmem:[%s2015_s0 + $0x88] sm:$0xff]  ;;  %v33_v24 = vld [vmem:[%s2015_s0 + $0x98] sm:$0xff] }
   0x7   :  { %v84_v25 = vpack.c.bf16 %v28_v22, %v26_v21  ;;  %v87_v26 = vpack.c.bf16 %v33_v24, %v31_v23  ;;  %v30_v27 = vld [vmem:[%s2015_s0 + $0x80] sm:$0xff]  ;;  %v32_v28 = vld [vmem:[%s2015_s0 + $0x90] sm:$0xff]  ;;  %v35_v29 = vld [vmem:[%s2015_s0 + $0xa8] sm:$0xff] }
   0x8   :  { %v37_v30 = vld [vmem:[%s2015_s0 + $0xb8] sm:$0xff]  ;;  %v86_v31 = vpack.c.bf16 %v32_v28, %v30_v27  ;;  %v34_v33 = vld [vmem:[%s2015_s0 + $0xa0] sm:$0xff]  ;;  %v36_v34 = vld [vmem:[%s2015_s0 + $0xb0] sm:$0xff] }
   0x9   :  { %209 = vmatpush1.bf16.msra.mxu0 %v80_v13  ;;  %1045 = vmatpush1.bf16.msra.mxu1 %v80_v13  ;;  %v89_v32 = vpack.c.bf16 %v37_v30, %v35_v29  ;;  %v39_v35 = vld [vmem:[%s2015_s0 + $0xc8] sm:$0xff]  ;;  %v41_v36 = vld [vmem:[%s2015_s0 + $0xd8] sm:$0xff]  ;;  %v88_v37 = vpack.c.bf16 %v36_v34, %v34_v33  ;;  %v38_v38 = vld [vmem:[%s2015_s0 + $0xc0] sm:$0xff] }
   0xa   :  { %210 = vmatprep.subr.bf16.mxu0 %v83_v14  ;;  %1030 = vmatprep.subr.bf16.mxu1 %v83_v14  ;;  %v40_v39 = vld [vmem:[%s2015_s0 + $0xd0] sm:$0xff]  ;;  %v91_v40 = vpack.c.bf16 %v41_v36, %v39_v35  ;;  %v43_v41 = vld [vmem:[%s2015_s0 + $0xe8] sm:$0xff]  ;;  %v45_v42 = vld [vmem:[%s2015_s0 + $0xf8] sm:$0xff] }
   0xb   :  { %v1069_v43 = vld [vmem:[%s2016_s1 + $0x4] ss:$8 sps:$4 sm:$0xff]   ;;  %v90_v45 = vpack.c.bf16 %v40_v39, %v38_v38  ;;  %v93_v47 = vpack.c.bf16 %v45_v42, %v43_v41  ;;  %v44_v48 = vld [vmem:[%s2015_s0 + $0xf0] sm:$0xff]  ;;  %v49_v50 = vld [vmem:[%s2015_s0 + $0x118] sm:$0xff] }
   0xc   :  { %v1072_v44 = vld [vmem:[%s2016_s1 + $0x44] ss:$8 sps:$4 sm:$0xff]   ;;  %238 = vmatprep.mubr.bf16.mxu0 %v1069_v43  ;;  %v48_v54 = vld [vmem:[%s2015_s0 + $0x110] sm:$0xff]  ;;  %v53_v56 = vld [vmem:[%s2015_s0 + $0x138] sm:$0xff] }
   0xd   :  { %211 = vmatpush1.bf16.msra.mxu0 %v82_v19  ;;  %1046 = vmatpush1.bf16.msra.mxu1 %v82_v19  ;;  %v42_v46 = vld [vmem:[%s2015_s0 + $0xe0] sm:$0xff]  ;;  %v47_v49 = vld [vmem:[%s2015_s0 + $0x108] sm:$0xff]  ;;  %v52_v60 = vld [vmem:[%s2015_s0 + $0x130] sm:$0xff] }
   0xe   :  { %212 = vmatprep.subr.bf16.mxu0 %v85_v20  ;;  %1031 = vmatprep.subr.bf16.mxu1 %v85_v20  ;;  %v92_v51 = vpack.c.bf16 %v44_v48, %v42_v46  ;;  %v46_v52 = vld [vmem:[%s2015_s0 + $0x100] sm:$0xff]  ;;  %v95_v53 = vpack.c.bf16 %v49_v50, %v47_v49  ;;  %v51_v55 = vld [vmem:[%s2015_s0 + $0x128] sm:$0xff]  ;;  %v57_v62 = vld [vmem:[%s2015_s0 + $0x158] sm:$0xff] }
   0xf   :  { %278 = vmatprep.mubr.bf16.mxu1 %v1072_v44  ;;  %v94_v57 = vpack.c.bf16 %v48_v54, %v46_v52  ;;  %v97_v58 = vpack.c.bf16 %v53_v56, %v51_v55  ;;  %v50_v59 = vld [vmem:[%s2015_s0 + $0x120] sm:$0xff]  ;;  %v55_v61 = vld [vmem:[%s2015_s0 + $0x148] sm:$0xff]  ;;  %v56_v2 = vld [vmem:[%s2015_s0 + $0x150] sm:$0xff] }
  0x10   :  { %v96_v63 = vpack.c.bf16 %v52_v60, %v50_v59  ;;  %v99_v0 = vpack.c.bf16 %v57_v62, %v55_v61  ;;  %v54_v1 = vld [vmem:[%s2015_s0 + $0x140] sm:$0xff]  ;;  %v59_v3 = vld [vmem:[%s2015_s0 + $0x168] sm:$0xff]  ;;  %v61_v4 = vld [vmem:[%s2015_s0 + $0x178] sm:$0xff] }
  0x11   :  { %213 = vmatpush1.bf16.msra.mxu0 %v84_v25  ;;  %1047 = vmatpush1.bf16.msra.mxu1 %v84_v25  ;;  %v98_v5 = vpack.c.bf16 %v56_v2, %v54_v1  ;;  %v101_v6 = vpack.c.bf16 %v61_v4, %v59_v3  ;;  %v58_v7 = vld [vmem:[%s2015_s0 + $0x160] sm:$0xff]  ;;  %v60_v8 = vld [vmem:[%s2015_s0 + $0x170] sm:$0xff]  ;;  %v63_v9 = vld [vmem:[%s2015_s0 + $0x188] sm:$0xff] }
  0x12   :  { %214 = vmatprep.subr.bf16.mxu0 %v87_v26  ;;  %1032 = vmatprep.subr.bf16.mxu1 %v87_v26  ;;  %v65_v10 = vld [vmem:[%s2015_s0 + $0x198] sm:$0xff]  ;;  %v100_v11 = vpack.c.bf16 %v60_v8, %v58_v7  ;;  %v62_v13 = vld [vmem:[%s2015_s0 + $0x180] sm:$0xff]  ;;  %v64_v14 = vld [vmem:[%s2015_s0 + $0x190] sm:$0xff] }
  0x13   :  { %v103_v12 = vpack.c.bf16 %v65_v10, %v63_v9  ;;  %v67_v15 = vld [vmem:[%s2015_s0 + $0x1a8] sm:$0xff]  ;;  %v69_v16 = vld [vmem:[%s2015_s0 + $0x1b8] sm:$0xff]  ;;  %v102_v17 = vpack.c.bf16 %v64_v14, %v62_v13  ;;  %v66_v19 = vld [vmem:[%s2015_s0 + $0x1a0] sm:$0xff] }
  0x14   :  { %v105_v18 = vpack.c.bf16 %v69_v16, %v67_v15  ;;  %v68_v20 = vld [vmem:[%s2015_s0 + $0x1b0] sm:$0xff]  ;;  %v71_v21 = vld [vmem:[%s2015_s0 + $0x1c8] sm:$0xff]  ;;  %v73_v22 = vld [vmem:[%s2015_s0 + $0x1d8] sm:$0xff] }
  0x15   :  { %215 = vmatpush1.bf16.msra.mxu0 %v86_v31  ;;  %1048 = vmatpush1.bf16.msra.mxu1 %v86_v31  ;;  %v104_v23 = vpack.c.bf16 %v68_v20, %v66_v19  ;;  %v107_v24 = vpack.c.bf16 %v73_v22, %v71_v21  ;;  %v70_v25 = vld [vmem:[%s2015_s0 + $0x1c0] sm:$0xff]  ;;  %v72_v26 = vld [vmem:[%s2015_s0 + $0x1d0] sm:$0xff]  ;;  %v75_v27 = vld [vmem:[%s2015_s0 + $0x1e8] sm:$0xff] }
  0x16   :  { %216 = vmatprep.subr.bf16.mxu0 %v89_v32  ;;  %1033 = vmatprep.subr.bf16.mxu1 %v89_v32  ;;  %v77_v28 = vld [vmem:[%s2015_s0 + $0x1f8] sm:$0xff]  ;;  %v106_v29 = vpack.c.bf16 %v72_v26, %v70_v25  ;;  %v74_v31 = vld [vmem:[%s2015_s0 + $0x1e0] sm:$0xff]  ;;  %v76_v32 = vld [vmem:[%s2015_s0 + $0x1f0] sm:$0xff] }
  0x17   :  { %v109_v30 = vpack.c.bf16 %v77_v28, %v75_v27  ;;  %v108_v33 = vpack.c.bf16 %v76_v32, %v74_v31  ;;  %v1067_v34 = vld [vmem:[%s2016_s1] ss:$8 sps:$4 sm:$0xff]   ;;  %v1073_v36 = vld [vmem:[%s2016_s1 + $0x14] ss:$8 sps:$4 sm:$0xff]   ;;  %v1075_v38 = vld [vmem:[%s2016_s1 + $0x10] ss:$8 sps:$4 sm:$0xff]  }
  0x18   :  { %v1070_v35 = vld [vmem:[%s2016_s1 + $0x40] ss:$8 sps:$4 sm:$0xff]   ;;  %v1078_v39 = vld [vmem:[%s2016_s1 + $0x50] ss:$8 sps:$4 sm:$0xff]   ;;  %v1082_v41 = vld [vmem:[%s2016_s1 + $0x64] ss:$8 sps:$4 sm:$0xff]  }
  0x19   :  { %217 = vmatpush1.bf16.msra.mxu0 %v88_v37  ;;  %1049 = vmatpush1.bf16.msra.mxu1 %v88_v37  ;;  %v1076_v37 = vld [vmem:[%s2016_s1 + $0x54] ss:$8 sps:$4 sm:$0xff]   ;;  %v1081_v42 = vld [vmem:[%s2016_s1 + $0x20] ss:$8 sps:$4 sm:$0xff]   ;;  %v1087_v46 = vld [vmem:[%s2016_s1 + $0x30] ss:$8 sps:$4 sm:$0xff]  }
  0x1a   :  { %218 = vmatprep.subr.bf16.mxu0 %v91_v40  ;;  %1034 = vmatprep.subr.bf16.mxu1 %v91_v40  ;;  %v1079_v40 = vld [vmem:[%s2016_s1 + $0x24] ss:$8 sps:$4 sm:$0xff]   ;;  %v1084_v43 = vld [vmem:[%s2016_s1 + $0x60] ss:$8 sps:$4 sm:$0xff]   ;;  %v1085_v44 = vld [vmem:[%s2016_s1 + $0x34] ss:$8 sps:$4 sm:$0xff]  }
  0x1d   :  { %219 = vmatpush1.bf16.msra.mxu0 %v90_v45  ;;  %1050 = vmatpush1.bf16.msra.mxu1 %v90_v45  ;;  %v1088_v45 = vld [vmem:[%s2016_s1 + $0x74] ss:$8 sps:$4 sm:$0xff]  }
  0x1e   :  { %220 = vmatprep.subr.bf16.mxu0 %v93_v47  ;;  %1035 = vmatprep.subr.bf16.mxu1 %v93_v47  ;;  %v1090_v47 = vld [vmem:[%s2016_s1 + $0x70] ss:$8 sps:$4 sm:$0xff]  }
  0x21   :  { %221 = vmatpush1.bf16.msra.mxu0 %v92_v51  ;;  %1051 = vmatpush1.bf16.msra.mxu1 %v92_v51 }
  0x22   :  { %222 = vmatprep.subr.bf16.mxu0 %v95_v53  ;;  %1036 = vmatprep.subr.bf16.mxu1 %v95_v53 }
  0x25   :  { %223 = vmatpush1.bf16.msra.mxu0 %v94_v57  ;;  %1052 = vmatpush1.bf16.msra.mxu1 %v94_v57 }
  0x26   :  { %224 = vmatprep.subr.bf16.mxu0 %v97_v58  ;;  %1037 = vmatprep.subr.bf16.mxu1 %v97_v58 }
  0x29   :  { %225 = vmatpush1.bf16.msra.mxu0 %v96_v63  ;;  %1053 = vmatpush1.bf16.msra.mxu1 %v96_v63 }
  0x2a   :  { %226 = vmatprep.subr.bf16.mxu0 %v99_v0  ;;  %1038 = vmatprep.subr.bf16.mxu1 %v99_v0 }
  0x2d   :  { %227 = vmatpush1.bf16.msra.mxu0 %v98_v5  ;;  %1054 = vmatpush1.bf16.msra.mxu1 %v98_v5 }
  0x2e   :  { %228 = vmatprep.subr.bf16.mxu0 %v101_v6  ;;  %1039 = vmatprep.subr.bf16.mxu1 %v101_v6 }
  0x31   :  { %229 = vmatpush1.bf16.msra.mxu0 %v100_v11  ;;  %1055 = vmatpush1.bf16.msra.mxu1 %v100_v11 }
  0x32   :  { %230 = vmatprep.subr.bf16.mxu0 %v103_v12  ;;  %1040 = vmatprep.subr.bf16.mxu1 %v103_v12 }
  0x35   :  { %231 = vmatpush1.bf16.msra.mxu0 %v102_v17  ;;  %1056 = vmatpush1.bf16.msra.mxu1 %v102_v17 }
  0x36   :  { %232 = vmatprep.subr.bf16.mxu0 %v105_v18  ;;  %1041 = vmatprep.subr.bf16.mxu1 %v105_v18 }
  0x39   :  { %233 = vmatpush1.bf16.msra.mxu0 %v104_v23  ;;  %1057 = vmatpush1.bf16.msra.mxu1 %v104_v23 }
  0x3a   :  { %234 = vmatprep.subr.bf16.mxu0 %v107_v24  ;;  %1042 = vmatprep.subr.bf16.mxu1 %v107_v24 }
  0x3d   :  { %235 = vmatpush1.bf16.msra.mxu0 %v106_v29  ;;  %1058 = vmatpush1.bf16.msra.mxu1 %v106_v29 }
  0x3e   :  { %236 = vmatprep.subr.bf16.mxu0 %v109_v30  ;;  %1043 = vmatprep.subr.bf16.mxu1 %v109_v30 }
  0x41   :  { %237 = vmatpush1.bf16.msra.mxu0 %v108_v33  ;;  %1059 = vmatpush1.bf16.msra.mxu1 %v108_v33 }
  0x44   :  { %239 = vmatmul.mubr.bf16.vlgmr.msra.gmra.mrb[0].mxu0 %v1067_v34  ;;  %279 = vmatmul.mubr.bf16.vlgmr.msra.gmra.mrb[0].mxu1 %v1070_v35 }
  0x45   :  { %248 = vmatprep.mubr.bf16.mxu0 %v1073_v36  ;;  %288 = vmatprep.mubr.bf16.mxu1 %v1076_v37 }
  0x4c   :  { %249 = vmatmul.mubr.bf16.gmra.mrb[4].mxu0 %v1075_v38  ;;  %289 = vmatmul.mubr.bf16.gmra.mrb[4].mxu1 %v1078_v39 }
  0x4d   :  { %258 = vmatprep.mubr.bf16.mxu0 %v1079_v40  ;;  %298 = vmatprep.mubr.bf16.mxu1 %v1082_v41 }
  0x54   :  { %259 = vmatmul.mubr.bf16.gmra.mrb[8].mxu0 %v1081_v42  ;;  %299 = vmatmul.mubr.bf16.gmra.mrb[8].mxu1 %v1084_v43 }
  0x55   :  { %268 = vmatprep.mubr.bf16.mxu0 %v1085_v44  ;;  %308 = vmatprep.mubr.bf16.mxu1 %v1088_v45 }
  0x5c   :  { %269 = vmatmul.mubr.bf16.gmra.mrb[12].mxu0 %v1087_v46  ;;  %309 = vmatmul.mubr.bf16.gmra.mrb[12].mxu1 %v1090_v47 }
 0x117   :  { %v1386_v48 = vpop.f32.mrb[0].mxu0  ;;  %v1388_v49 = vpop.f32.mrb[0].mxu1 }
 0x118   :  { %v1390_v50 = vpop.f32.mrb[1].mxu0  ;;  %v1392_v51 = vpop.f32.mrb[1].mxu1  ;;  %v384_v52 = vmul.f32 %v1386_v48, %v1386_v48  ;;  %v400_v53 = vmul.f32 %v1388_v49, %v1388_v49 }
 0x119   :  { %v385_v54 = vmul.f32 %v1390_v50, %v1390_v50  ;;  %v401_v55 = vmul.f32 %v1392_v51, %v1392_v51  ;;  %v1402_v56 = vpop.f32.mrb[2].mxu0  ;;  %v1404_v57 = vpop.f32.mrb[2].mxu1  ;;  %v320_v58 = vsel %vm319_vm0, %v1390_v50, 0.0  ;;  %v352_v59 = vsel %vm319_vm0, %v1392_v51, 0.0 }
 0x11a   :  { %v1410_v60 = vpop.f32.mrb[3].mxu0  ;;  %v1412_v61 = vpop.f32.mrb[3].mxu1  ;;  %v321_v62 = vadd.f32 %v320_v58, %v1386_v48  ;;  %v353_v63 = vadd.f32 %v352_v59, %v1388_v49  ;;  %v386_v0 = vmul.f32 %v1402_v56, %v1402_v56  ;;  %v402_v1 = vmul.f32 %v1404_v57, %v1404_v57 }
 0x11b   :  { %v387_v2 = vmul.f32 %v1410_v60, %v1410_v60  ;;  %v403_v3 = vmul.f32 %v1412_v61, %v1412_v61  ;;  %v356_v4 = vsel %vm319_vm0, %v1412_v61, 0.0  ;;  %v324_v5 = vsel %vm319_vm0, %v1410_v60, 0.0 }
 0x11c   :  { %322 = vadd.xlane.f32.xlu0 %v321_v62  ;;  %v357_v6 = vadd.f32 %v356_v4, %v1404_v57  ;;  %v325_v7 = vadd.f32 %v324_v5, %v1402_v56  ;;  %v416_v8 = vsel %vm319_vm0, %v385_v54, 0.0  ;;  %v448_v9 = vsel %vm319_vm0, %v401_v55, 0.0 }
 0x11d   :  { %v420_v10 = vsel %vm319_vm0, %v387_v2, 0.0  ;;  %v452_v11 = vsel %vm319_vm0, %v403_v3, 0.0  ;;  %v417_v12 = vadd.f32 %v416_v8, %v384_v52  ;;  %v1434_v13 = vadd.f32 %v448_v9, %v400_v53 }
 0x11e   :  { %358 = vadd.xlane.f32.xlu1 %v357_v6  ;;  %v421_v14 = vadd.f32 %v420_v10, %v386_v0  ;;  %v453_v15 = vadd.f32 %v452_v11, %v402_v1 }
 0x11f   :  { %v1436_v16 = vpop.f32.mrb[4].mxu0  ;;  %v1438_v17 = vpop.f32.mrb[4].mxu1 }
 0x120   :  { %354 = vadd.xlane.f32.xlu0 %v353_v63  ;;  %v1440_v18 = vpop.f32.mrb[5].mxu0  ;;  %v1442_v19 = vpop.f32.mrb[5].mxu1  ;;  %v388_v20 = vmul.f32 %v1436_v16, %v1436_v16  ;;  %v404_v21 = vmul.f32 %v1438_v17, %v1438_v17 }
 0x121   :  { %v389_v22 = vmul.f32 %v1440_v18, %v1440_v18  ;;  %v1450_v23 = vpop.f32.mrb[6].mxu0  ;;  %v405_v24 = vmul.f32 %v1442_v19, %v1442_v19  ;;  %v1454_v25 = vpop.f32.mrb[6].mxu1  ;;  %v328_v26 = vsel %vm319_vm0, %v1440_v18, 0.0  ;;  %v360_v27 = vsel %vm319_vm0, %v1442_v19, 0.0 }
 0x122   :  { %422 = vadd.xlane.f32.xlu1 %v421_v14  ;;  %v1460_v28 = vpop.f32.mrb[7].mxu0  ;;  %v1462_v29 = vpop.f32.mrb[7].mxu1  ;;  %v329_v30 = vadd.f32 %v328_v26, %v1436_v16  ;;  %v361_v31 = vadd.f32 %v360_v27, %v1438_v17  ;;  %v390_v32 = vmul.f32 %v1450_v23, %v1450_v23  ;;  %v406_v33 = vmul.f32 %v1454_v25, %v1454_v25 }
 0x123   :  { %v391_v34 = vmul.f32 %v1460_v28, %v1460_v28  ;;  %v407_v35 = vmul.f32 %v1462_v29, %v1462_v29  ;;  %v332_v36 = vsel %vm319_vm0, %v1460_v28, 0.0  ;;  %v364_v37 = vsel %vm319_vm0, %v1462_v29, 0.0 }
 0x124   :  { %326 = vadd.xlane.f32.xlu0 %v325_v7  ;;  %v333_v38 = vadd.f32 %v332_v36, %v1450_v23  ;;  %v365_v39 = vadd.f32 %v364_v37, %v1454_v25  ;;  %v424_v40 = vsel %vm319_vm0, %v389_v22, 0.0  ;;  %v456_v41 = vsel %vm319_vm0, %v405_v24, 0.0 }
 0x125   :  { %v1482_v42 = vadd.f32 %v424_v40, %v388_v20  ;;  %v428_v43 = vsel %vm319_vm0, %v391_v34, 0.0  ;;  %v1485_v44 = vadd.f32 %v456_v41, %v404_v21  ;;  %v460_v45 = vsel %vm319_vm0, %v407_v35, 0.0 }
 0x126   :  { %454 = vadd.xlane.f32.xlu1 %v453_v15  ;;  %v1488_v46 = vadd.f32 %v428_v43, %v390_v32  ;;  %v1490_v47 = vadd.f32 %v460_v45, %v406_v33 }
 0x127   :  { %v1492_v52 = vpop.f32.mrb[8].mxu0  ;;  %v1494_v53 = vpop.f32.mrb[8].mxu1 }
 0x128   :  { %418 = vadd.xlane.f32.xlu0 %v417_v12  ;;  %v1496_v54 = vpop.f32.mrb[9].mxu0  ;;  %v1498_v55 = vpop.f32.mrb[9].mxu1  ;;  %v392_v58 = vmul.f32 %v1492_v52, %v1492_v52  ;;  %v408_v59 = vmul.f32 %v1494_v53, %v1494_v53 }
 0x129   :  { %v393_v62 = vmul.f32 %v1496_v54, %v1496_v54  ;;  %v1506_v63 = vpop.f32.mrb[10].mxu0  ;;  %v409_v0 = vmul.f32 %v1498_v55, %v1498_v55  ;;  %v1510_v1 = vpop.f32.mrb[10].mxu1  ;;  %v336_v2 = vsel %vm319_vm0, %v1496_v54, 0.0  ;;  %v368_v3 = vsel %vm319_vm0, %v1498_v55, 0.0 }
 0x12a   :  { %2031 = vst [vmem:[#allocation2_spill] sm:$0xff] %v1506_v63  ;;  %2032 = vst [vmem:[#allocation3_spill] sm:$0xff] %v1510_v1  ;;  %330 = vadd.xlane.f32.xlu1 %v329_v30  ;;  %v1516_v4 = vpop.f32.mrb[11].mxu0  ;;  %v1518_v5 = vpop.f32.mrb[11].mxu1  ;;  %v337_v6 = vadd.f32 %v336_v2, %v1492_v52  ;;  %v369_v7 = vadd.f32 %v368_v3, %v1494_v53  ;;  %v394_v8 = vmul.f32 %v1506_v63, %v1506_v63 }
 0x12b   :  { %2033 = vst [vmem:[#allocation4_spill] sm:$0xff] %v1516_v4  ;;  %2034 = vst [vmem:[#allocation5_spill] sm:$0xff] %v1518_v5  ;;  %v410_v9 = vmul.f32 %v1510_v1, %v1510_v1  ;;  %v395_v10 = vmul.f32 %v1516_v4, %v1516_v4  ;;  %v411_v11 = vmul.f32 %v1518_v5, %v1518_v5  ;;  %v340_v12 = vsel %vm319_vm0, %v1516_v4, 0.0 }
 0x12c   :  { %v372_v14 = vsel %vm319_vm0, %v1518_v5, 0.0  ;;  %450 = vadd.xlane.f32.xlu0 %v1434_v13  ;;  %v341_v15 = vadd.f32 %v340_v12, %v1506_v63  ;;  %v432_v21 = vsel %vm319_vm0, %v393_v62, 0.0  ;;  %v464_v22 = vsel %vm319_vm0, %v409_v0, 0.0 }
 0x12d   :  { %v373_v20 = vadd.f32 %v372_v14, %v1510_v1  ;;  %v433_v24 = vadd.f32 %v432_v21, %v392_v58  ;;  %v436_v26 = vsel %vm319_vm0, %v395_v10, 0.0  ;;  %v465_v27 = vadd.f32 %v464_v22, %v408_v59 }
 0x12e   :  { %v468_v30 = vsel %vm319_vm0, %v411_v11, 0.0  ;;  %334 = vadd.xlane.f32.xlu1 %v333_v38  ;;  %v437_v32 = vadd.f32 %v436_v26, %v394_v8 }
 0x12f   :  { %v469_v33 = vadd.f32 %v468_v30, %v410_v9  ;;  %v1541_v34 = vpop.f32.mrb[12].mxu0  ;;  %v1543_v13 = vpop.f32.mrb[12].mxu1 }
 0x130   :  { %2035 = vst [vmem:[#allocation6_spill] sm:$0xff] %v1541_v34  ;;  %2036 = vst [vmem:[#allocation7_spill] sm:$0xff] %v1543_v13  ;;  %362 = vadd.xlane.f32.xlu0 %v361_v31  ;;  %v1545_v35 = vpop.f32.mrb[13].mxu0  ;;  %v1547_v36 = vpop.f32.mrb[13].mxu1  ;;  %v396_v37 = vmul.f32 %v1541_v34, %v1541_v34  ;;  %v412_v40 = vmul.f32 %v1543_v13, %v1543_v13 }
 0x131   :  { %2037 = vst [vmem:[#allocation8_spill] sm:$0xff] %v1545_v35  ;;  %2038 = vst [vmem:[#allocation9_spill] sm:$0xff] %v1547_v36  ;;  %v397_v38 = vmul.f32 %v1545_v35, %v1545_v35  ;;  %v1555_v41 = vpop.f32.mrb[14].mxu0  ;;  %v413_v43 = vmul.f32 %v1547_v36, %v1547_v36  ;;  %v1559_v45 = vpop.f32.mrb[14].mxu1  ;;  %v344_v31 = vsel %vm319_vm0, %v1545_v35, 0.0  ;;  %v376_v58 = vsel %vm319_vm0, %v1547_v36, 0.0 }
 0x132   :  { %2039 = vst [vmem:[#allocation10_spill] sm:$0xff] %v1555_v41  ;;  %2040 = vst [vmem:[#allocation11_spill] sm:$0xff] %v1559_v45  ;;  %366 = vadd.xlane.f32.xlu1 %v365_v39  ;;  %v1565_v59 = vpop.f32.mrb[15].mxu0  ;;  %v1567_v62 = vpop.f32.mrb[15].mxu1  ;;  %v345_v0 = vadd.f32 %v344_v31, %v1541_v34  ;;  %v377_v2 = vadd.f32 %v376_v58, %v1543_v13  ;;  %v398_v3 = vmul.f32 %v1555_v41, %v1555_v41 }
 0x133   :  { %2041 = vst [vmem:[#allocation12_spill] sm:$0xff] %v1565_v59  ;;  %2042 = vst [vmem:[#allocation13_spill] sm:$0xff] %v1567_v62  ;;  %v414_v8 = vmul.f32 %v1559_v45, %v1559_v45  ;;  %v348_v9 = vsel %vm319_vm0, %v1565_v59, 0.0  ;;  %v399_v39 = vmul.f32 %v1565_v59, %v1565_v59  ;;  %v380_v10 = vsel %vm319_vm0, %v1567_v62, 0.0 }
 0x134   :  { %v415_v11 = vmul.f32 %v1567_v62, %v1567_v62  ;;  %426 = vadd.xlane.f32.xlu0 %v1482_v42  ;;  %v349_v12 = vadd.f32 %v348_v9, %v1555_v41  ;;  %v381_v14 = vadd.f32 %v380_v10, %v1559_v45  ;;  %v440_v21 = vsel %vm319_vm0, %v397_v38, 0.0 }
 0x135   :  { %v472_v22 = vsel %vm319_vm0, %v413_v43, 0.0  ;;  %v441_v26 = vadd.f32 %v440_v21, %v396_v37  ;;  %v444_v30 = vsel %vm319_vm0, %v399_v39, 0.0  ;;  %v1123_v42 = vmov 0  }
 0x136   :  { %v473_v31 = vadd.f32 %v472_v22, %v412_v40  ;;  %v476_v58 = vsel %vm319_vm0, %v415_v11, 0.0  ;;  %430 = vadd.xlane.f32.xlu1 %v1488_v46  ;;  %v445_v36 = vadd.f32 %v444_v30, %v398_v3  ;;  %1063 = vset.pattern.permute.xlu0 %v1123_v42 }
 0x137   :  { %v477_v62 = vadd.f32 %v476_v58, %v414_v8  ;;  %1064 = vset.pattern.permute.xlu1 %v1123_v42 }
 0x138   :  { %458 = vadd.xlane.f32.xlu0 %v1485_v44 }
 0x13a   :  { %462 = vadd.xlane.f32.xlu1 %v1490_v47 }
 0x13c   :  { %338 = vadd.xlane.f32.xlu0 %v337_v6 }
 0x13e   :  { %342 = vadd.xlane.f32.xlu1 %v341_v15 }
 0x140   :  { %370 = vadd.xlane.f32.xlu0 %v369_v7 }
 0x142   :  { %374 = vadd.xlane.f32.xlu1 %v373_v20 }
 0x144   :  { %434 = vadd.xlane.f32.xlu0 %v433_v24 }
 0x146   :  { %438 = vadd.xlane.f32.xlu1 %v437_v32 }
 0x148   :  { %466 = vadd.xlane.f32.xlu0 %v465_v27 }
 0x14a   :  { %470 = vadd.xlane.f32.xlu1 %v469_v33 }
 0x14c   :  { %346 = vadd.xlane.f32.xlu0 %v345_v0 }
 0x14e   :  { %350 = vadd.xlane.f32.xlu1 %v349_v12 }
 0x150   :  { %378 = vadd.xlane.f32.xlu0 %v377_v2 }
 0x152   :  { %382 = vadd.xlane.f32.xlu1 %v381_v14 }
 0x154   :  { %442 = vadd.xlane.f32.xlu0 %v441_v26 }
 0x156   :  { %446 = vadd.xlane.f32.xlu1 %v445_v36 }
 0x158   :  { %474 = vadd.xlane.f32.xlu0 %v473_v31 }
 0x15a   :  { %478 = vadd.xlane.f32.xlu1 %v477_v62 }
 0x1a9   :  { %v323_v44 = vpop.xlane.xlu0 %322 }
 0x1aa   :  { %v1595_v20 = vmul.f32 0.0051020407, %v323_v44 }
 0x1ab   :  { %v359_v46 = vpop.xlane.xlu1 %358 }
 0x1ac   :  { %v1593_v7 = vmul.f32 0.0051020407, %v359_v46  ;;  %v512_v38 = vmul.f32 %v1595_v20, %v1595_v20 }
 0x1ad   :  { %v355_v47 = vpop.xlane.xlu0 %354 }
 0x1ae   :  { %v521_v32 = vmul.f32 %v1593_v7, %v1593_v7  ;;  %v1605_v2 = vmul.f32 0.0051020407, %v355_v47 }
 0x1af   :  { %v423_v6 = vpop.xlane.xlu1 %422 }
 0x1b0   :  { %v497_v33 = vmul.f32 0.0051020407, %v423_v6  ;;  %v520_v21 = vmul.f32 %v1605_v2, %v1605_v2 }
 0x1b1   :  { %v327_v15 = vpop.xlane.xlu0 %326 }
 0x1b2   :  { %v1597_v24 = vmul.f32 0.0051020407, %v327_v15 }
 0x1b3   :  { %v455_v27 = vpop.xlane.xlu1 %454 }
 0x1b4   :  { %v513_v36 = vmul.f32 %v1597_v24, %v1597_v24  ;;  %v505_v37 = vmul.f32 0.0051020407, %v455_v27 }
 0x1b5   :  { %v419_v40 = vpop.xlane.xlu0 %418 }
 0x1b6   :  { %v529_v43 = vsub.f32 %v497_v33, %v513_v36  ;;  %v537_v62 = vsub.f32 %v505_v37, %v521_v32  ;;  %v496_v0 = vmul.f32 0.0051020407, %v419_v40  ;;  %v1622_v40 = vld [vmem:[%s2017_s2 + $0x8] sm:$0xff] }
 0x1b7   :  { %v331_v3 = vpop.xlane.xlu1 %330 }
 0x1b8   :  { %v545_v8 = vmax.f32 %v529_v43, 0.0  ;;  %v553_v9 = vmax.f32 %v537_v62, 0.0  ;;  %v528_v39 = vsub.f32 %v496_v0, %v512_v38  ;;  %v1609_v42 = vmul.f32 0.0051020407, %v331_v3 }
 0x1b9   :  { %v451_v10 = vpop.xlane.xlu0 %450 }
 0x1ba   :  { %v577_v11 = vadd.f32 1e-05, %v545_v8  ;;  %v585_v12 = vadd.f32 1e-05, %v553_v9  ;;  %v544_v14 = vmax.f32 %v528_v39, 0.0  ;;  %v514_v27 = vmul.f32 %v1609_v42, %v1609_v42 }
 0x1bb   :  { %v504_v22 = vmul.f32 0.0051020407, %v451_v10  ;;  %v335_v26 = vpop.xlane.xlu1 %334 }
 0x1bc   :  { %1091 = vrsqrt.f32 %v577_v11  ;;  %v576_v30 = vadd.f32 1e-05, %v544_v14  ;;  %v1611_v47 = vmul.f32 0.0051020407, %v335_v26  ;;  %v1631_v11 = vld [vmem:[%s2017_s2] sm:$0xff] }
 0x1bd   :  { %1093 = vrsqrt.f32 %v585_v12  ;;  %v536_v31 = vsub.f32 %v504_v22, %v520_v21  ;;  %v363_v58 = vpop.xlane.xlu0 %362 }
 0x1be   :  { %1095 = vrsqrt.f32 %v576_v30  ;;  %v1615_v32 = vmul.f32 0.0051020407, %v363_v58  ;;  %v515_v38 = vmul.f32 %v1611_v47, %v1611_v47 }
 0x1bf   :  { %v552_v44 = vmax.f32 %v536_v31, 0.0  ;;  %v367_v46 = vpop.xlane.xlu1 %366 }
 0x1c0   :  { %v1617_v36 = vmul.f32 0.0051020407, %v367_v46  ;;  %v522_v8 = vmul.f32 %v1615_v32, %v1615_v32  ;;  %v1639_v46 = vld [vmem:[%s2017_s2 + $0x48] sm:$0xff] }
 0x1c1   :  { %v584_v6 = vadd.f32 1e-05, %v552_v44  ;;  %v427_v15 = vpop.xlane.xlu0 %426 }
 0x1c2   :  { %v498_v33 = vmul.f32 0.0051020407, %v427_v15  ;;  %v523_v21 = vmul.f32 %v1617_v36, %v1617_v36 }
 0x1c3   :  { %1097 = vrsqrt.f32 %v584_v6  ;;  %v431_v37 = vpop.xlane.xlu1 %430 }
 0x1c4   :  { %v530_v43 = vsub.f32 %v498_v33, %v514_v27  ;;  %v499_v62 = vmul.f32 0.0051020407, %v431_v37 }
 0x1c5   :  { %v459_v0 = vpop.xlane.xlu0 %458 }
 0x1c6   :  { %v1092_v3 = vpop.eup %1091  ;;  %v546_v9 = vmax.f32 %v530_v43, 0.0  ;;  %v531_v39 = vsub.f32 %v499_v62, %v515_v38  ;;  %v506_v10 = vmul.f32 0.0051020407, %v459_v0 }
 0x1c7   :  { %v1094_v12 = vpop.eup %1093  ;;  %v609_v14 = vmul.f32 %v1092_v3, %v1622_v40  ;;  %v463_v22 = vpop.xlane.xlu1 %462 }
 0x1c8   :  { %v1096_v26 = vpop.eup %1095  ;;  %v578_v30 = vadd.f32 1e-05, %v546_v9  ;;  %v547_v31 = vmax.f32 %v531_v39, 0.0  ;;  %v538_v58 = vsub.f32 %v506_v10, %v522_v8  ;;  %v507_v44 = vmul.f32 0.0051020407, %v463_v22  ;;  %v1649_v8 = vld [vmem:[%s2017_s2 + $0x40] sm:$0xff] }
 0x1c9   :  { %v339_v6 = vpop.xlane.xlu0 %338  ;;  %727 = vperm.xlu1 %1064, %v609_v14   ;;  %v608_v15 = vmul.f32 %v1096_v26, %v1631_v11  ;;  %v625_v38 = vmul.f32 %v609_v14, %v1597_v24  ;;  %v1644_v62 = vmul.f32 %v1094_v12, %v1639_v46 }
 0x1ca   :  { %1099 = vrsqrt.f32 %v578_v30  ;;  %v579_v27 = vadd.f32 1e-05, %v547_v31  ;;  %v554_v33 = vmax.f32 %v538_v58, 0.0  ;;  %v539_v37 = vsub.f32 %v507_v44, %v523_v21 }
 0x1cb   :  { %v343_v43 = vpop.xlane.xlu1 %342  ;;  %722 = vperm.xlu0 %1063, %v608_v15   ;;  %v624_v24 = vmul.f32 %v608_v15, %v1595_v20  ;;  %v1653_v14 = vmul.f32 0.0051020407, %v339_v6  ;;  %v633_v21 = vmul.f32 %v1644_v62, %v1593_v7  ;;  %v1673_v7 = vld [vmem:[%s2017_s2 + $0x10] sm:$0xff] }
 0x1cc   :  { %1101 = vrsqrt.f32 %v579_v27  ;;  %v586_v0 = vadd.f32 1e-05, %v554_v33  ;;  %v555_v3 = vmax.f32 %v539_v37, 0.0  ;;  %v1661_v26 = vmul.f32 0.0051020407, %v343_v43 }
 0x1cd   :  { %v1098_v9 = vpop.eup %1097  ;;  %v371_v39 = vpop.xlane.xlu0 %370  ;;  %658 = vrot.lane.b32.xlu1 %v625_v38, %s1124_s15  ;;  %v516_v31 = vmul.f32 %v1653_v14, %v1653_v14 }
 0x1ce   :  { %1103 = vrsqrt.f32 %v586_v0  ;;  %v587_v10 = vadd.f32 1e-05, %v555_v3  ;;  %v1659_v22 = vmul.f32 %v1098_v9, %v1649_v8  ;;  %v1668_v58 = vmul.f32 0.0051020407, %v371_v39 }
 0x1cf   :  { %v375_v12 = vpop.xlane.xlu1 %374  ;;  %656 = vrot.lane.b32.xlu0 %v624_v24, %s1124_s15 }
 0x1d0   :  { %1105 = vrsqrt.f32 %v587_v10  ;;  %v632_v20 = vmul.f32 %v1659_v22, %v1605_v2  ;;  %v1675_v6 = vmul.f32 0.0051020407, %v375_v12  ;;  %v517_v2 = vmul.f32 %v1661_v26, %v1661_v26  ;;  %v1686_v10 = vld [vmem:[%s2017_s2 + $0x50] sm:$0xff]  ;;  %v1691_v12 = vld [vmem:[%s2017_s2 + $0x18] sm:$0xff] }
 0x1d1   :  { %v435_v30 = vpop.xlane.xlu0 %434  ;;  %674 = vrot.lane.b32.xlu1 %v633_v21, %s1124_s15  ;;  %v524_v3 = vmul.f32 %v1668_v58, %v1668_v58 }
 0x1d2   :  { %v500_v44 = vmul.f32 0.0051020407, %v435_v30  ;;  %v525_v21 = vmul.f32 %v1675_v6, %v1675_v6 }
 0x1d3   :  { %v439_v15 = vpop.xlane.xlu1 %438  ;;  %672 = vrot.lane.b32.xlu0 %v632_v20, %s1124_s15 }
 0x1d4   :  { %v1100_v27 = vpop.eup %1099  ;;  %v532_v33 = vsub.f32 %v500_v44, %v516_v31  ;;  %v501_v37 = vmul.f32 0.0051020407, %v439_v15 }
 0x1d5   :  { %v467_v38 = vpop.xlane.xlu0 %466  ;;  %v610_v43 = vmul.f32 %v1100_v27, %v1673_v7 }
 0x1d6   :  { %v1102_v0 = vpop.eup %1101  ;;  %v548_v9 = vmax.f32 %v532_v33, 0.0  ;;  %v533_v39 = vsub.f32 %v501_v37, %v517_v2  ;;  %v508_v24 = vmul.f32 0.0051020407, %v467_v38 }
 0x1d7   :  { %v471_v30 = vpop.xlane.xlu1 %470  ;;  %732 = vperm.xlu1 %1064, %v610_v43   ;;  %v626_v33 = vmul.f32 %v610_v43, %v1609_v42  ;;  %v1700_v38 = vmul.f32 %v1102_v0, %v1691_v12 }
 0x1d8   :  { %v1104_v20 = vpop.eup %1103  ;;  %v580_v31 = vadd.f32 1e-05, %v548_v9  ;;  %v549_v44 = vmax.f32 %v533_v39, 0.0  ;;  %v540_v15 = vsub.f32 %v508_v24, %v524_v3  ;;  %v509_v27 = vmul.f32 0.0051020407, %v471_v30  ;;  %v1705_v9 = vld [vmem:[%s2017_s2 + $0x58] sm:$0xff] }
 0x1d9   :  { %v347_v2 = vpop.xlane.xlu0 %346  ;;  %v1697_v37 = vmul.f32 %v1104_v20, %v1686_v10  ;;  %v627_v24 = vmul.f32 %v1700_v38, %v1611_v47 }
 0x1da   :  { %v1106_v45 = vpop.eup %1105  ;;  %1107 = vrsqrt.f32 %v580_v31  ;;  %v581_v13 = vadd.f32 1e-05, %v549_v44  ;;  %v556_v59 = vmax.f32 %v540_v15, 0.0  ;;  %v541_v41 = vsub.f32 %v509_v27, %v525_v21  ;;  %v1730_v44 = vld [vmem:[%s2017_s2 + $0x20] sm:$0xff] }
 0x1db   :  { %660 = vrot.lane.b32.xlu1 %v626_v33, %s1124_s15  ;;  %v351_v3 = vpop.xlane.xlu1 %350  ;;  %v634_v42 = vmul.f32 %v1697_v37, %v1615_v32  ;;  %v1714_v21 = vmul.f32 %v1106_v45, %v1705_v9  ;;  %v1716_v20 = vmul.f32 0.0051020407, %v347_v2 }
 0x1dc   :  { %1109 = vrsqrt.f32 %v581_v13  ;;  %v588_v43 = vadd.f32 1e-05, %v556_v59  ;;  %v557_v0 = vmax.f32 %v541_v41, 0.0  ;;  %v1719_v13 = vmul.f32 0.0051020407, %v351_v3 }
 0x1dd   :  { %676 = vrot.lane.b32.xlu0 %v634_v42, %s1124_s15  ;;  %v379_v39 = vpop.xlane.xlu0 %378  ;;  %v635_v59 = vmul.f32 %v1714_v21, %v1617_v36  ;;  %v518_v47 = vmul.f32 %v1716_v20, %v1716_v20  ;;  %v1740_v42 = vld [vmem:[%s2017_s2 + $0x28] sm:$0xff] }
 0x1de   :  { %1111 = vrsqrt.f32 %v588_v43  ;;  %v589_v30 = vadd.f32 1e-05, %v557_v0  ;;  %v1725_v32 = vmul.f32 0.0051020407, %v379_v39  ;;  %v519_v36 = vmul.f32 %v1719_v13, %v1719_v13 }
 0x1df   :  { %662 = vrot.lane.b32.xlu1 %v627_v24, %s1124_s15  ;;  %v383_v31 = vpop.xlane.xlu1 %382 }
 0x1e0   :  { %1113 = vrsqrt.f32 %v589_v30  ;;  %v1732_v15 = vmul.f32 0.0051020407, %v383_v31  ;;  %v526_v24 = vmul.f32 %v1725_v32, %v1725_v32 }
 0x1e1   :  { %v443_v41 = vpop.xlane.xlu0 %442 }
 0x1e2   :  { %v502_v45 = vmul.f32 0.0051020407, %v443_v41 }
 0x1e3   :  { %678 = vrot.lane.b32.xlu1 %v635_v59, %s1124_s15  ;;  %v447_v27 = vpop.xlane.xlu1 %446  ;;  %v1748_v59 = vld [vmem:[%s2017_s2 + $0x60] sm:$0xff] }
 0x1e4   :  { %v1108_v2 = vpop.eup %1107  ;;  %v534_v33 = vsub.f32 %v502_v45, %v518_v47  ;;  %v503_v3 = vmul.f32 0.0051020407, %v447_v27  ;;  %v527_v47 = vmul.f32 %v1732_v15, %v1732_v15 }
 0x1e5   :  { %v475_v43 = vpop.xlane.xlu0 %474  ;;  %v612_v0 = vmul.f32 %v1108_v2, %v1730_v44 }
 0x1e6   :  { %v1110_v39 = vpop.eup %1109  ;;  %v550_v30 = vmax.f32 %v534_v33, 0.0  ;;  %v535_v31 = vsub.f32 %v503_v3, %v519_v36  ;;  %v510_v41 = vmul.f32 0.0051020407, %v475_v43  ;;  %v1757_v36 = vld [vmem:[%s2017_s2 + $0x68] sm:$0xff] }
 0x1e7   :  { %v479_v45 = vpop.xlane.xlu1 %478  ;;  %v628_v27 = vmul.f32 %v612_v0, %v1653_v14  ;;  %v613_v2 = vmul.f32 %v1110_v39, %v1740_v42 }
 0x1e8   :  { %v1112_v35 = vpop.eup %1111  ;;  %v582_v34 = vadd.f32 1e-05, %v550_v30  ;;  %v551_v5 = vmax.f32 %v535_v31, 0.0  ;;  %v542_v1 = vsub.f32 %v510_v41, %v526_v24  ;;  %v511_v33 = vmul.f32 0.0051020407, %v479_v45 }
 0x1e9   :  { %664 = vrot.lane.b32.xlu0 %v628_v27, %s1124_s15  ;;  %v629_v3 = vmul.f32 %v613_v2, %v1661_v26  ;;  %v620_v43 = vmul.f32 %v1112_v35, %v1748_v59  ;;  %v1789_v27 = vld [vmem:[%s2017_s2 + $0x78] sm:$0xff] }
 0x1ea   :  { %v1114_v4 = vpop.eup %1113  ;;  %1115 = vrsqrt.f32 %v582_v34  ;;  %v583_v14 = vadd.f32 1e-05, %v551_v5  ;;  %v558_v39 = vmax.f32 %v542_v1, 0.0  ;;  %v543_v63 = vsub.f32 %v511_v33, %v527_v47  ;;  %v1771_v1 = vld [vmem:[%s2017_s2 + $0x30] sm:$0xff] }
 0x1eb   :  { %666 = vrot.lane.b32.xlu1 %v629_v3, %s1124_s15  ;;  %v636_v24 = vmul.f32 %v620_v43, %v1668_v58  ;;  %v621_v30 = vmul.f32 %v1114_v4, %v1757_v36  ;;  %v1776_v4 = vld [vmem:[%s2017_s2 + $0x38] sm:$0xff]  ;;  %v1782_v58 = vld [vmem:[%s2017_s2 + $0x70] sm:$0xff] }
 0x1ec   :  { %1117 = vrsqrt.f32 %v583_v14  ;;  %v590_v31 = vadd.f32 1e-05, %v558_v39  ;;  %v559_v41 = vmax.f32 %v543_v63, 0.0 }
 0x1ed   :  { %680 = vrot.lane.b32.xlu0 %v636_v24, %s1124_s15  ;;  %v637_v26 = vmul.f32 %v621_v30, %v1675_v6 }
 0x1ee   :  { %1119 = vrsqrt.f32 %v590_v31  ;;  %v591_v35 = vadd.f32 1e-05, %v559_v41 }
 0x1ef   :  { %682 = vrot.lane.b32.xlu1 %v637_v26, %s1124_s15 }
 0x1f0   :  { %1121 = vrsqrt.f32 %v591_v35 }
 0x1f4   :  { %v1116_v5 = vpop.eup %1115 }
 0x1f5   :  { %v614_v63 = vmul.f32 %v1116_v5, %v1771_v1 }
 0x1f6   :  { %v1118_v34 = vpop.eup %1117 }
 0x1f7   :  { %v630_v6 = vmul.f32 %v614_v63, %v1716_v20  ;;  %v615_v47 = vmul.f32 %v1118_v34, %v1776_v4 }
 0x1f8   :  { %v1120_v45 = vpop.eup %1119 }
 0x1f9   :  { %668 = vrot.lane.b32.xlu0 %v630_v6, %s1124_s15  ;;  %v631_v33 = vmul.f32 %v615_v47, %v1719_v13  ;;  %v622_v3 = vmul.f32 %v1120_v45, %v1782_v58  ;;  %v1125_v13 = vmov 1  }
 0x1fa   :  { %v1122_v14 = vpop.eup %1121 }
 0x1fb   :  { %670 = vrot.lane.b32.xlu1 %v631_v33, %s1124_s15  ;;  %v638_v39 = vmul.f32 %v622_v3, %v1725_v32  ;;  %v623_v20 = vmul.f32 %v1122_v14, %v1789_v27 }
 0x1fd   :  { %684 = vrot.lane.b32.xlu0 %v638_v39, %s1124_s15  ;;  %v639_v24 = vmul.f32 %v623_v20, %v1732_v15 }
 0x1ff   :  { %686 = vrot.lane.b32.xlu1 %v639_v24, %s1124_s15 }
 0x201   :  { %737 = vperm.xlu0 %1063, %v1700_v38  }
 0x203   :  { %742 = vperm.xlu1 %1064, %v612_v0  }
 0x205   :  { %747 = vperm.xlu0 %1063, %v613_v2  }
 0x207   :  { %752 = vperm.xlu1 %1064, %v614_v63  }
 0x209   :  { %757 = vperm.xlu0 %1063, %v615_v47  }
 0x20b   :  { %762 = vperm.xlu1 %1064, %v1659_v22  }
 0x20d   :  { %767 = vperm.xlu0 %1063, %v1644_v62  }
 0x20f   :  { %772 = vperm.xlu1 %1064, %v1697_v37  }
 0x211   :  { %777 = vperm.xlu0 %1063, %v1714_v21  }
 0x213   :  { %782 = vperm.xlu1 %1064, %v620_v43  }
 0x215   :  { %787 = vperm.xlu0 %1063, %v621_v30  }
 0x217   :  { %792 = vperm.xlu1 %1064, %v622_v3  }
 0x219   :  { %797 = vperm.xlu0 %1063, %v623_v20  }
 0x21b   :  { %1065 = vset.pattern.permute.xlu1 %v1125_v13 }
 0x21d   :  { %1066 = vset.pattern.permute.xlu0 %v1125_v13 }
 0x248   :  { %v728_v38 = vpop.permute.xlu1 %727 }
 0x249   :  { %v1806_v32 = vmul.f32 %v728_v38, %v1402_v56  ;;  %v1809_v15 = vmul.f32 %v728_v38, %v1410_v60 }
 0x24a   :  { %v723_v22 = vpop.permute.xlu0 %722 }
 0x24b   :  { %v1812_v62 = vmul.f32 %v723_v22, %v1386_v48  ;;  %v1815_v37 = vmul.f32 %v723_v22, %v1390_v50 }
 0x24c   :  { %v659_v21 = vpop.permute.xlu1 %658 }
 0x24d   :  { %v705_v48 = vsub.f32 %v1622_v40, %v659_v21 }
 0x24e   :  { %v657_v0 = vpop.permute.xlu0 %656 }
 0x24f   :  { %v704_v2 = vsub.f32 %v1631_v11, %v657_v0 }
 0x250   :  { %v675_v43 = vpop.permute.xlu1 %674 }
 0x251   :  { %834 = vperm.xlu1 %1065, %v704_v2   ;;  %v713_v56 = vsub.f32 %v1639_v46, %v675_v43 }
 0x252   :  { %v673_v30 = vpop.permute.xlu0 %672 }
 0x253   :  { %v712_v31 = vsub.f32 %v1649_v8, %v673_v30 }
 0x255   :  { %874 = vperm.xlu0 %1066, %v712_v31   ;;  %879 = vperm.xlu1 %1065, %v713_v56  }
 0x256   :  { %v677_v60 = vpop.permute.xlu0 %676  ;;  %v733_v41 = vpop.permute.xlu1 %732 }
 0x257   :  { %v1822_v50 = vmul.f32 %v733_v41, %v1436_v16  ;;  %v1825_v26 = vmul.f32 %v733_v41, %v1440_v18  ;;  %v714_v35 = vsub.f32 %v1686_v10, %v677_v60 }
 0x259   :  { %839 = vperm.xlu0 %1066, %v705_v48  }
 0x25a   :  { %v661_v11 = vpop.permute.xlu1 %660 }
 0x25b   :  { %v706_v46 = vsub.f32 %v1673_v7, %v661_v11  ;;  %v665_v5 = vpop.permute.xlu0 %664 }
 0x25c   :  { %v708_v63 = vsub.f32 %v1730_v44, %v665_v5 }
 0x25d   :  { %884 = vperm.xlu0 %1066, %v714_v35   ;;  %844 = vperm.xlu1 %1065, %v706_v46  }
 0x25e   :  { %v663_v8 = vpop.permute.xlu1 %662 }
 0x25f   :  { %v707_v40 = vsub.f32 %v1691_v12, %v663_v8  ;;  %v681_v34 = vpop.permute.xlu0 %680 }
 0x260   :  { %v716_v18 = vsub.f32 %v1748_v59, %v681_v34 }
 0x261   :  { %854 = vperm.xlu0 %1066, %v708_v63   ;;  %849 = vperm.xlu1 %1065, %v707_v40  }
 0x262   :  { %v679_v16 = vpop.permute.xlu1 %678 }
 0x263   :  { %v715_v6 = vsub.f32 %v1705_v9, %v679_v16 }
 0x265   :  { %894 = vperm.xlu0 %1066, %v716_v18   ;;  %889 = vperm.xlu1 %1065, %v715_v6  }
 0x266   :  { %v667_v10 = vpop.permute.xlu1 %666 }
 0x267   :  { %v709_v7 = vsub.f32 %v1740_v42, %v667_v10 }
 0x269   :  { %859 = vperm.xlu1 %1065, %v709_v7  }
 0x26a   :  { %v683_v47 = vpop.permute.xlu1 %682 }
 0x26b   :  { %v717_v45 = vsub.f32 %v1757_v36, %v683_v47  ;;  %v669_v44 = vpop.permute.xlu0 %668 }
 0x26c   :  { %v710_v12 = vsub.f32 %v1771_v1, %v669_v44 }
 0x26d   :  { %899 = vperm.xlu1 %1065, %v717_v45  }
 0x26e   :  { %864 = vperm.xlu0 %1066, %v710_v12   ;;  %v671_v33 = vpop.permute.xlu1 %670 }
 0x26f   :  { %v711_v3 = vsub.f32 %v1776_v4, %v671_v33  ;;  %v685_v59 = vpop.permute.xlu0 %684 }
 0x270   :  { %v718_v9 = vsub.f32 %v1782_v58, %v685_v59 }
 0x271   :  { %869 = vperm.xlu1 %1065, %v711_v3  }
 0x272   :  { %904 = vperm.xlu0 %1066, %v718_v9   ;;  %v687_v14 = vpop.permute.xlu1 %686 }
 0x273   :  { %v719_v42 = vsub.f32 %v1789_v27, %v687_v14 }
 0x275   :  { %909 = vperm.xlu1 %1065, %v719_v42  }
 0x280   :  { %v738_v39 = vpop.permute.xlu0 %737 }
 0x281   :  { %v807_v44 = vmul.f32 %v738_v39, %v1460_v28 }
 0x282   :  { %v743_v20 = vpop.permute.xlu1 %742 }
 0x283   :  { %v808_v12 = vmul.f32 %v743_v20, %v1492_v52  ;;  %v809_v33 = vmul.f32 %v743_v20, %v1496_v54 }
 0x284   :  { %v1839_v36 = vpop.permute.xlu0 %747 }
 0x286   :  { %v1841_v24 = vpop.permute.xlu1 %752 }
 0x288   :  { %v1843_v1 = vpop.permute.xlu0 %757 }
 0x28a   :  { %v763_v13 = vpop.permute.xlu1 %762 }
 0x28b   :  { %v816_v56 = vmul.f32 %v763_v13, %v1388_v49  ;;  %v817_v31 = vmul.f32 %v763_v13, %v1392_v51 }
 0x28c   :  { %v768_v38 = vpop.permute.xlu0 %767 }
 0x28d   :  { %v818_v60 = vmul.f32 %v768_v38, %v1404_v57  ;;  %v819_v41 = vmul.f32 %v768_v38, %v1412_v61 }
 0x28e   :  { %v773_v4 = vpop.permute.xlu1 %772 }
 0x28f   :  { %v820_v16 = vmul.f32 %v773_v4, %v1438_v17  ;;  %v821_v18 = vmul.f32 %v773_v4, %v1442_v19  ;;  %v806_v19 = vmul.f32 %v738_v39, %v1450_v23 }
 0x290   :  { %v1845_v22 = vpop.permute.xlu0 %777 }
 0x292   :  { %v1847_v58 = vpop.permute.xlu1 %782 }
 0x293   :  { %v824_v39 = vmul.f32 %v1847_v58, %v1494_v53  ;;  %v825_v20 = vmul.f32 %v1847_v58, %v1498_v55 }
 0x294   :  { %v1849_v21 = vpop.permute.xlu0 %787 }
 0x296   :  { %v1851_v0 = vpop.permute.xlu1 %792 }
 0x298   :  { %v1853_v27 = vpop.permute.xlu0 %797 }
 0x2d0   :  { %v835_v2 = vpop.permute.xlu1 %834 }
 0x2d1   :  { %v912_v43 = vadd.f32 %v835_v2, %v1812_v62  ;;  %v913_v30 = vadd.f32 %v835_v2, %v1815_v37 }
 0x2d3   :  { %v944_v48 = vmax.f32 %v912_v43, 0.0  ;;  %v945_v11 = vmax.f32 %v913_v30, 0.0 }
 0x2d4   :  { %v875_v35 = vpop.permute.xlu0 %874  ;;  %v880_v46 = vpop.permute.xlu1 %879 }
 0x2d5   :  { %976 = vst [vmem:[%s2018_s3] sm:$0xff] %v944_v48  ;;  %977 = vst.msk [vmem:[%s2018_s3 + $0x8] sm:$0xff] %vm319_vm0, %v945_v11  ;;  %v928_v49 = vadd.f32 %v875_v35, %v816_v56  ;;  %v929_v62 = vadd.f32 %v875_v35, %v817_v31  ;;  %v930_v51 = vadd.f32 %v880_v46, %v818_v60  ;;  %v2044_v31 = vld [vmem:[#allocation4_spill] sm:$0xff] }
 0x2d6   :  { %v931_v37 = vadd.f32 %v880_v46, %v819_v41  ;;  %v811_v60 = vmul.f32 %v1839_v36, %v2044_v31 }
 0x2d7   :  { %v960_v57 = vmax.f32 %v928_v49, 0.0  ;;  %v961_v5 = vmax.f32 %v929_v62, 0.0  ;;  %v962_v61 = vmax.f32 %v930_v51, 0.0  ;;  %v2045_v62 = vld [vmem:[#allocation3_spill] sm:$0xff] }
 0x2d8   :  { %v963_v8 = vmax.f32 %v931_v37, 0.0  ;;  %v840_v63 = vpop.permute.xlu0 %839  ;;  %v826_v51 = vmul.f32 %v1849_v21, %v2045_v62  ;;  %v2046_v37 = vld [vmem:[#allocation5_spill] sm:$0xff] }
 0x2d9   :  { %992 = vst [vmem:[%s2018_s3 + $0x80] sm:$0xff] %v960_v57  ;;  %993 = vst.msk [vmem:[%s2018_s3 + $0x88] sm:$0xff] %vm319_vm0, %v961_v5  ;;  %v914_v40 = vadd.f32 %v840_v63, %v1806_v32  ;;  %v915_v34 = vadd.f32 %v840_v63, %v1809_v15  ;;  %v827_v57 = vmul.f32 %v1849_v21, %v2046_v37 }
 0x2da   :  { %994 = vst [vmem:[%s2018_s3 + $0x90] sm:$0xff] %v962_v61  ;;  %995 = vst.msk [vmem:[%s2018_s3 + $0x98] sm:$0xff] %vm319_vm0, %v963_v8  ;;  %v2047_v8 = vld [vmem:[#allocation6_spill] sm:$0xff] }
 0x2db   :  { %v946_v6 = vmax.f32 %v914_v40, 0.0  ;;  %v947_v10 = vmax.f32 %v915_v34, 0.0  ;;  %v812_v63 = vmul.f32 %v1841_v24, %v2047_v8  ;;  %v2048_v40 = vld [vmem:[#allocation8_spill] sm:$0xff] }
 0x2dc   :  { %v885_v7 = vpop.permute.xlu0 %884  ;;  %v845_v47 = vpop.permute.xlu1 %844  ;;  %v813_v34 = vmul.f32 %v1841_v24, %v2048_v40 }
 0x2dd   :  { %978 = vst [vmem:[%s2018_s3 + $0x10] sm:$0xff] %v946_v6  ;;  %979 = vst.msk [vmem:[%s2018_s3 + $0x18] sm:$0xff] %vm319_vm0, %v947_v10  ;;  %v932_v32 = vadd.f32 %v885_v7, %v820_v16  ;;  %v933_v45 = vadd.f32 %v885_v7, %v821_v18  ;;  %v916_v15 = vadd.f32 %v845_v47, %v1822_v50 }
 0x2de   :  { %v917_v17 = vadd.f32 %v845_v47, %v1825_v26  ;;  %v822_v50 = vmul.f32 %v1845_v22, %v1454_v25  ;;  %v823_v26 = vmul.f32 %v1845_v22, %v1462_v29  ;;  %v2043_v22 = vld [vmem:[#allocation2_spill] sm:$0xff] }
 0x2df   :  { %v964_v3 = vmax.f32 %v932_v32, 0.0  ;;  %v965_v59 = vmax.f32 %v933_v45, 0.0  ;;  %v948_v9 = vmax.f32 %v916_v15, 0.0  ;;  %v810_v58 = vmul.f32 %v1839_v36, %v2043_v22  ;;  %v2049_v47 = vld [vmem:[#allocation10_spill] sm:$0xff]  ;;  %v2050_v45 = vld [vmem:[#allocation12_spill] sm:$0xff] }
 0x2e0   :  { %v949_v14 = vmax.f32 %v917_v17, 0.0  ;;  %v855_v42 = vpop.permute.xlu0 %854  ;;  %v850_v13 = vpop.permute.xlu1 %849  ;;  %v814_v32 = vmul.f32 %v1843_v1, %v2049_v47  ;;  %v815_v24 = vmul.f32 %v1843_v1, %v2050_v45 }
 0x2e1   :  { %996 = vst [vmem:[%s2018_s3 + $0xa0] sm:$0xff] %v964_v3  ;;  %997 = vst.msk [vmem:[%s2018_s3 + $0xa8] sm:$0xff] %vm319_vm0, %v965_v59  ;;  %v920_v23 = vadd.f32 %v855_v42, %v808_v12  ;;  %v921_v28 = vadd.f32 %v855_v42, %v809_v33  ;;  %v918_v52 = vadd.f32 %v850_v13, %v806_v19  ;;  %v2051_v19 = vld [vmem:[#allocation7_spill] sm:$0xff]  ;;  %v2052_v12 = vld [vmem:[#allocation9_spill] sm:$0xff] }
 0x2e2   :  { %980 = vst [vmem:[%s2018_s3 + $0x20] sm:$0xff] %v948_v9  ;;  %981 = vst.msk [vmem:[%s2018_s3 + $0x28] sm:$0xff] %vm319_vm0, %v949_v14  ;;  %v919_v54 = vadd.f32 %v850_v13, %v807_v44  ;;  %v828_v44 = vmul.f32 %v1851_v0, %v2051_v19  ;;  %v829_v33 = vmul.f32 %v1851_v0, %v2052_v12 }
 0x2e3   :  { %v952_v38 = vmax.f32 %v920_v23, 0.0  ;;  %v953_v4 = vmax.f32 %v921_v28, 0.0  ;;  %v950_v2 = vmax.f32 %v918_v52, 0.0  ;;  %v2053_v23 = vld [vmem:[#allocation11_spill] sm:$0xff]  ;;  %v2054_v52 = vld [vmem:[#allocation13_spill] sm:$0xff] }
 0x2e4   :  { %v951_v43 = vmax.f32 %v919_v54, 0.0  ;;  %v895_v30 = vpop.permute.xlu0 %894  ;;  %v890_v56 = vpop.permute.xlu1 %889  ;;  %v830_v28 = vmul.f32 %v1853_v27, %v2053_v23  ;;  %v831_v54 = vmul.f32 %v1853_v27, %v2054_v52 }
 0x2e5   :  { %984 = vst [vmem:[%s2018_s3 + $0x40] sm:$0xff] %v952_v38  ;;  %985 = vst.msk [vmem:[%s2018_s3 + $0x48] sm:$0xff] %vm319_vm0, %v953_v4  ;;  %v936_v25 = vadd.f32 %v895_v30, %v824_v39  ;;  %v937_v29 = vadd.f32 %v895_v30, %v825_v20  ;;  %v934_v53 = vadd.f32 %v890_v56, %v822_v50 }
 0x2e6   :  { %982 = vst [vmem:[%s2018_s3 + $0x30] sm:$0xff] %v950_v2  ;;  %983 = vst.msk [vmem:[%s2018_s3 + $0x38] sm:$0xff] %vm319_vm0, %v951_v43  ;;  %v935_v55 = vadd.f32 %v890_v56, %v823_v26 }
 0x2e7   :  { %v968_v41 = vmax.f32 %v936_v25, 0.0  ;;  %v969_v48 = vmax.f32 %v937_v29, 0.0  ;;  %v966_v11 = vmax.f32 %v934_v53, 0.0 }
 0x2e8   :  { %v967_v35 = vmax.f32 %v935_v55, 0.0  ;;  %v860_v46 = vpop.permute.xlu1 %859 }
 0x2e9   :  { %1000 = vst [vmem:[%s2018_s3 + $0xc0] sm:$0xff] %v968_v41  ;;  %1001 = vst.msk [vmem:[%s2018_s3 + $0xc8] sm:$0xff] %vm319_vm0, %v969_v48  ;;  %v922_v36 = vadd.f32 %v860_v46, %v810_v58  ;;  %v923_v49 = vadd.f32 %v860_v46, %v811_v60 }
 0x2ea   :  { %998 = vst [vmem:[%s2018_s3 + $0xb0] sm:$0xff] %v966_v11  ;;  %999 = vst.msk [vmem:[%s2018_s3 + $0xb8] sm:$0xff] %vm319_vm0, %v967_v35 }
 0x2eb   :  { %v954_v5 = vmax.f32 %v922_v36, 0.0  ;;  %v955_v61 = vmax.f32 %v923_v49, 0.0 }
 0x2ec   :  { %v900_v16 = vpop.permute.xlu1 %899 }
 0x2ed   :  { %986 = vst [vmem:[%s2018_s3 + $0x50] sm:$0xff] %v954_v5  ;;  %987 = vst.msk [vmem:[%s2018_s3 + $0x58] sm:$0xff] %vm319_vm0, %v955_v61  ;;  %v938_v18 = vadd.f32 %v900_v16, %v826_v51  ;;  %v939_v21 = vadd.f32 %v900_v16, %v827_v57  ;;  %v865_v6 = vpop.permute.xlu0 %864 }
 0x2ee   :  { %v924_v10 = vadd.f32 %v865_v6, %v812_v63  ;;  %v925_v7 = vadd.f32 %v865_v6, %v813_v34 }
 0x2ef   :  { %v970_v15 = vmax.f32 %v938_v18, 0.0  ;;  %v971_v17 = vmax.f32 %v939_v21, 0.0 }
 0x2f0   :  { %v956_v3 = vmax.f32 %v924_v10, 0.0  ;;  %v957_v59 = vmax.f32 %v925_v7, 0.0  ;;  %v870_v9 = vpop.permute.xlu1 %869 }
 0x2f1   :  { %1002 = vst [vmem:[%s2018_s3 + $0xd0] sm:$0xff] %v970_v15  ;;  %1003 = vst.msk [vmem:[%s2018_s3 + $0xd8] sm:$0xff] %vm319_vm0, %v971_v17  ;;  %v926_v1 = vadd.f32 %v870_v9, %v814_v32  ;;  %v927_v14 = vadd.f32 %v870_v9, %v815_v24  ;;  %v905_v42 = vpop.permute.xlu0 %904 }
 0x2f2   :  { %988 = vst [vmem:[%s2018_s3 + $0x60] sm:$0xff] %v956_v3  ;;  %989 = vst.msk [vmem:[%s2018_s3 + $0x68] sm:$0xff] %vm319_vm0, %v957_v59  ;;  %v940_v0 = vadd.f32 %v905_v42, %v828_v44  ;;  %v941_v13 = vadd.f32 %v905_v42, %v829_v33 }
 0x2f3   :  { %v958_v50 = vmax.f32 %v926_v1, 0.0  ;;  %v959_v26 = vmax.f32 %v927_v14, 0.0 }
 0x2f4   :  { %v972_v39 = vmax.f32 %v940_v0, 0.0  ;;  %v973_v20 = vmax.f32 %v941_v13, 0.0  ;;  %v910_v38 = vpop.permute.xlu1 %909 }
 0x2f5   :  { %990 = vst [vmem:[%s2018_s3 + $0x70] sm:$0xff] %v958_v50  ;;  %991 = vst.msk [vmem:[%s2018_s3 + $0x78] sm:$0xff] %vm319_vm0, %v959_v26  ;;  %v942_v4 = vadd.f32 %v910_v38, %v830_v28  ;;  %v943_v2 = vadd.f32 %v910_v38, %v831_v54 }
 0x2f6   :  { %1004 = vst [vmem:[%s2018_s3 + $0xe0] sm:$0xff] %v972_v39  ;;  %1005 = vst.msk [vmem:[%s2018_s3 + $0xe8] sm:$0xff] %vm319_vm0, %v973_v20 }
 0x2f7   :  { %v974_v27 = vmax.f32 %v942_v4, 0.0  ;;  %v975_v43 = vmax.f32 %v943_v2, 0.0 }
 0x2f9   :  { %1006 = vst [vmem:[%s2018_s3 + $0xf0] sm:$0xff] %v974_v27  ;;  %1007 = vst.msk [vmem:[%s2018_s3 + $0xf8] sm:$0xff] %vm319_vm0, %v975_v43 }

</bundles_post_ra>
